<compile_context>
chip_gen: v5e
topology: v5e:2x2
jax: 0.10.0
libtpu: 0.0.40
codegen_flags: <defaults>
</compile_context>

<pallas_src>
import jax
import jax.numpy as jnp
from jax.experimental import pallas as pl
from jax.experimental.pallas import tpu as pltpu


def _round_up(n, m):
    return ((n + m - 1) // m) * m


def _mlp_kernel(x_ref, w1_ref, b1_ref, w2_ref, b2_ref,
                w3_ref, b3_ref, w4_ref, b4_ref, o_ref):
    # x arrives as f32 (single HBM read); cast to bf16 on the VPU for the MXU.
    x = x_ref[...].astype(jnp.bfloat16)

    h = jnp.dot(x, w1_ref[...], preferred_element_type=jnp.float32) + b1_ref[...]
    h = jnp.maximum(h, 0.0).astype(jnp.bfloat16)

    h = jnp.dot(h, w2_ref[...], preferred_element_type=jnp.float32) + b2_ref[...]
    h = jnp.maximum(h, 0.0).astype(jnp.bfloat16)

    h = jnp.dot(h, w3_ref[...], preferred_element_type=jnp.float32) + b3_ref[...]
    h = jnp.maximum(h, 0.0).astype(jnp.bfloat16)

    h = jnp.dot(h, w4_ref[...], preferred_element_type=jnp.float32) + b4_ref[...]
    o_ref[...] = h.astype(o_ref.dtype)  # (TB, d_out) f32 store, no lane padding


def prepare_params(params):
    """One-time preprocessing: bf16 weights for the MXU, f32 biases for the accumulator."""
    prepped = {}
    for i in range(1, 5):
        prepped[f"w{i}"] = params[f"w{i}"].astype(jnp.bfloat16)
        prepped[f"b{i}"] = params[f"b{i}"].astype(jnp.float32)
    return prepped


def _choose_tb(B, tb_max):
    """Batch tile: multiple of 8 (f32 sublane), <= tb_max, and >=2 tiles when the
    batch is large enough so the 'parallel' grid axis can span both v7x cores."""
    TB = min(tb_max, _round_up(B, 8))
    if B > 8 and TB >= B:
        TB = _round_up((B + 1) // 2, 8)
    return TB


def mlp_forward(x, prepped, *, tb_max=2048):
    """x: (B, D_in) f32. prepped: output of prepare_params (w* bf16 (in,out), b* f32 (1,out))."""
    w1, b1 = prepped["w1"], prepped["b1"]
    w2, b2 = prepped["w2"], prepped["b2"]
    w3, b3 = prepped["w3"], prepped["b3"]
    w4, b4 = prepped["w4"], prepped["b4"]

    B, d_in = x.shape
    d_out = w4.shape[1]

    TB = _choose_tb(B, tb_max)
    B_pad = _round_up(B, TB)

    xb = x if B_pad == B else jnp.pad(x, ((0, B_pad - B), (0, 0)))

    grid = (B_pad // TB,)

    def tile_spec(shape):
        # Tiled along the batch grid axis.
        return pl.BlockSpec(shape, lambda i: (i, 0))

    def resident_spec(shape):
        # Same block index every grid step -> fetched once, stays in VMEM.
        return pl.BlockSpec(shape, lambda i: (0, 0))

    out = pl.pallas_call(
        _mlp_kernel,
        out_shape=jax.ShapeDtypeStruct((B_pad, d_out), jnp.float32),
        grid=grid,
        in_specs=[
            tile_spec((TB, d_in)),
            resident_spec(w1.shape), resident_spec(b1.shape),
            resident_spec(w2.shape), resident_spec(b2.shape),
            resident_spec(w3.shape), resident_spec(b3.shape),
            resident_spec(w4.shape), resident_spec(b4.shape),
        ],
        out_specs=tile_spec((TB, d_out)),
        compiler_params=pltpu.CompilerParams(
            # Independent batch tiles -> shard across both v7x TensorCores.
            dimension_semantics=("parallel",),
        ),
    )(xb, w1, b1, w2, b2, w3, b3, w4, b4)

    return out[:B] if B_pad != B else out


def init_params(key, d_in, hidden, d_out):
    """Deterministic init mimicking PyTorch Linear default (U[-1/sqrt(fan_in), +])."""
    dims = [d_in, hidden[0], hidden[1], hidden[2], d_out]
    params = {}
    for i in range(4):
        fan_in, fan_out = dims[i], dims[i + 1]
        key, kw, kb = jax.random.split(key, 3)
        bound = 1.0 / jnp.sqrt(fan_in)
        params[f"w{i+1}"] = jax.random.uniform(
            kw, (fan_in, fan_out), jnp.float32, -bound, bound)
        params[f"b{i+1}"] = jax.random.uniform(
            kb, (1, fan_out), jnp.float32, -bound, bound)
    return params


def mlp_reference(x, params):
    h = x
    for i in range(1, 4):
        h = jnp.maximum(h @ params[f"w{i}"] + params[f"b{i}"], 0.0)
    return h @ params["w4"] + params["b4"]


if __name__ == "__main__":
    # Small shapes consistent with Net(D_in, H, D_out): D_in=32, H=[64,64,32], D_out=8.
    D_IN, HID, D_OUT = 32, (64, 64, 32), 8

    key = jax.random.PRNGKey(0)
    key, kx1, kx2 = jax.random.split(key, 3)
    params = init_params(key, D_IN, HID, D_OUT)
    prepped = prepare_params(params)  # hoisted one-time bf16 cast of weights

    # Case 1: tiny batch (single tile, no padding).
    x1 = jax.random.normal(kx1, (8, D_IN), jnp.float32)
    out1 = jax.block_until_ready(mlp_forward(x1, prepped))
    ref1 = mlp_reference(x1, params)
    assert out1.shape == (8, D_OUT)
    err1 = float(jnp.max(jnp.abs(out1 - ref1)))
    assert jnp.allclose(out1, ref1, atol=5e-2, rtol=5e-2), f"mismatch (max err {err1})"

    # Case 2: small ragged batch (exercises multi-tile grid + batch padding path).
    x2 = jax.random.normal(kx2, (40, D_IN), jnp.float32)
    out2 = jax.block_until_ready(mlp_forward(x2, prepped))
    ref2 = mlp_reference(x2, params)
    assert out2.shape == (40, D_OUT)
    err2 = float(jnp.max(jnp.abs(out2 - ref2)))
    assert jnp.allclose(out2, ref2, atol=5e-2, rtol=5e-2), f"mismatch (max err {err2})"

    print("KERNEL_OK")
</pallas_src>

<mosaic_0001>
module attributes {stable_mosaic.version = 11 : i64} {
  func.func @_mlp_kernel(%arg0: i32, %arg1: memref<8x32xf32, #tpu.memory_space<vmem>>, %arg2: memref<32x64xbf16, #tpu.memory_space<vmem>>, %arg3: memref<1x64xf32, #tpu.memory_space<vmem>>, %arg4: memref<64x64xbf16, #tpu.memory_space<vmem>>, %arg5: memref<1x64xf32, #tpu.memory_space<vmem>>, %arg6: memref<64x32xbf16, #tpu.memory_space<vmem>>, %arg7: memref<1x32xf32, #tpu.memory_space<vmem>>, %arg8: memref<32x8xbf16, #tpu.memory_space<vmem>>, %arg9: memref<1x8xf32, #tpu.memory_space<vmem>>, %arg10: memref<8x8xf32, #tpu.memory_space<vmem>>) attributes {dimension_semantics = [#tpu.dimension_semantics<parallel>], iteration_bounds = array<i64: 1>, scalar_prefetch = 0 : i64, scratch_operands = 0 : i64, tpu.core_type = #tpu.core_type<tc>, window_params = [{transform_indices = @transform_0, window_bounds = array<i64: 8, 32>}, {pipeline_mode = #tpu.pipeline_mode<synchronous>, transform_indices = @transform_1, window_bounds = array<i64: 32, 64>}, {pipeline_mode = #tpu.pipeline_mode<synchronous>, transform_indices = @transform_2, window_bounds = array<i64: 1, 64>}, {pipeline_mode = #tpu.pipeline_mode<synchronous>, transform_indices = @transform_3, window_bounds = array<i64: 64, 64>}, {pipeline_mode = #tpu.pipeline_mode<synchronous>, transform_indices = @transform_4, window_bounds = array<i64: 1, 64>}, {pipeline_mode = #tpu.pipeline_mode<synchronous>, transform_indices = @transform_5, window_bounds = array<i64: 64, 32>}, {pipeline_mode = #tpu.pipeline_mode<synchronous>, transform_indices = @transform_6, window_bounds = array<i64: 1, 32>}, {pipeline_mode = #tpu.pipeline_mode<synchronous>, transform_indices = @transform_7, window_bounds = array<i64: 32, 8>}, {pipeline_mode = #tpu.pipeline_mode<synchronous>, transform_indices = @transform_8, window_bounds = array<i64: 1, 8>}, {transform_indices = @transform_9, window_bounds = array<i64: 8, 8>}]} {
    %c0 = arith.constant 0 : index
    %c0_0 = arith.constant 0 : index
    %0 = vector.load %arg1[%c0, %c0_0] : memref<8x32xf32, #tpu.memory_space<vmem>>, vector<8x32xf32>
    %1 = arith.truncf %0 : vector<8x32xf32> to vector<8x32xbf16>
    %c0_1 = arith.constant 0 : index
    %c0_2 = arith.constant 0 : index
    %2 = vector.load %arg2[%c0_1, %c0_2] : memref<32x64xbf16, #tpu.memory_space<vmem>>, vector<32x64xbf16>
    %cst = arith.constant dense<0.000000e+00> : vector<8x64xf32>
    %3 = tpu.matmul %1, %2, %cst {dimension_numbers = #tpu.dot_dimension_numbers<[1], [0], [0], [1], [0, 0, 1, 1], [], []>} : vector<8x32xbf16>, vector<32x64xbf16>, vector<8x64xf32> -> vector<8x64xf32>
    %c0_3 = arith.constant 0 : index
    %c0_4 = arith.constant 0 : index
    %4 = vector.load %arg3[%c0_3, %c0_4] : memref<1x64xf32, #tpu.memory_space<vmem>>, vector<1x64xf32>
    %5 = vector.broadcast %4 : vector<1x64xf32> to vector<8x64xf32>
    %6 = arith.addf %3, %5 : vector<8x64xf32>
    %cst_5 = arith.constant 0.000000e+00 : f32
    %7 = vector.broadcast %cst_5 : f32 to vector<8x64xf32>
    %8 = arith.maximumf %6, %7 : vector<8x64xf32>
    %9 = arith.truncf %8 : vector<8x64xf32> to vector<8x64xbf16>
    %c0_6 = arith.constant 0 : index
    %c0_7 = arith.constant 0 : index
    %10 = vector.load %arg4[%c0_6, %c0_7] : memref<64x64xbf16, #tpu.memory_space<vmem>>, vector<64x64xbf16>
    %cst_8 = arith.constant dense<0.000000e+00> : vector<8x64xf32>
    %11 = tpu.matmul %9, %10, %cst_8 {dimension_numbers = #tpu.dot_dimension_numbers<[1], [0], [0], [1], [0, 0, 1, 1], [], []>} : vector<8x64xbf16>, vector<64x64xbf16>, vector<8x64xf32> -> vector<8x64xf32>
    %c0_9 = arith.constant 0 : index
    %c0_10 = arith.constant 0 : index
    %12 = vector.load %arg5[%c0_9, %c0_10] : memref<1x64xf32, #tpu.memory_space<vmem>>, vector<1x64xf32>
    %13 = vector.broadcast %12 : vector<1x64xf32> to vector<8x64xf32>
    %14 = arith.addf %11, %13 : vector<8x64xf32>
    %cst_11 = arith.constant 0.000000e+00 : f32
    %15 = vector.broadcast %cst_11 : f32 to vector<8x64xf32>
    %16 = arith.maximumf %14, %15 : vector<8x64xf32>
    %17 = arith.truncf %16 : vector<8x64xf32> to vector<8x64xbf16>
    %c0_12 = arith.constant 0 : index
    %c0_13 = arith.constant 0 : index
    %18 = vector.load %arg6[%c0_12, %c0_13] : memref<64x32xbf16, #tpu.memory_space<vmem>>, vector<64x32xbf16>
    %cst_14 = arith.constant dense<0.000000e+00> : vector<8x32xf32>
    %19 = tpu.matmul %17, %18, %cst_14 {dimension_numbers = #tpu.dot_dimension_numbers<[1], [0], [0], [1], [0, 0, 1, 1], [], []>} : vector<8x64xbf16>, vector<64x32xbf16>, vector<8x32xf32> -> vector<8x32xf32>
    %c0_15 = arith.constant 0 : index
    %c0_16 = arith.constant 0 : index
    %20 = vector.load %arg7[%c0_15, %c0_16] : memref<1x32xf32, #tpu.memory_space<vmem>>, vector<1x32xf32>
    %21 = vector.broadcast %20 : vector<1x32xf32> to vector<8x32xf32>
    %22 = arith.addf %19, %21 : vector<8x32xf32>
    %cst_17 = arith.constant 0.000000e+00 : f32
    %23 = vector.broadcast %cst_17 : f32 to vector<8x32xf32>
    %24 = arith.maximumf %22, %23 : vector<8x32xf32>
    %25 = arith.truncf %24 : vector<8x32xf32> to vector<8x32xbf16>
    %c0_18 = arith.constant 0 : index
    %c0_19 = arith.constant 0 : index
    %26 = vector.load %arg8[%c0_18, %c0_19] : memref<32x8xbf16, #tpu.memory_space<vmem>>, vector<32x8xbf16>
    %cst_20 = arith.constant dense<0.000000e+00> : vector<8x8xf32>
    %27 = tpu.matmul %25, %26, %cst_20 {dimension_numbers = #tpu.dot_dimension_numbers<[1], [0], [0], [1], [0, 0, 1, 1], [], []>} : vector<8x32xbf16>, vector<32x8xbf16>, vector<8x8xf32> -> vector<8x8xf32>
    %c0_21 = arith.constant 0 : index
    %c0_22 = arith.constant 0 : index
    %28 = vector.load %arg9[%c0_21, %c0_22] : memref<1x8xf32, #tpu.memory_space<vmem>>, vector<1x8xf32>
    %29 = vector.broadcast %28 : vector<1x8xf32> to vector<8x8xf32>
    %30 = arith.addf %27, %29 : vector<8x8xf32>
    %c0_23 = arith.constant 0 : index
    %c0_24 = arith.constant 0 : index
    %31 = vector.load %arg10[%c0_23, %c0_24] : memref<8x8xf32, #tpu.memory_space<vmem>>, vector<8x8xf32>
    tpu.vector_store %arg10[%c0_23, %c0_24], %30 {strides = array<i32>} : memref<8x8xf32, #tpu.memory_space<vmem>>, vector<8x8xf32>,
    return
  }
  func.func @transform_0(%arg0: i32) -> (i32, i32) {
    %c0_i32 = arith.constant 0 : i32
    %c0_i32_0 = arith.constant 0 : i32
    return %arg0, %c0_i32 : i32, i32
  }
  func.func @transform_1(%arg0: i32) -> (i32, i32) {
    %c0_i32 = arith.constant 0 : i32
    %c0_i32_0 = arith.constant 0 : i32
    %c0_i32_1 = arith.constant 0 : i32
    return %c0_i32, %c0_i32_0 : i32, i32
  }
  func.func @transform_2(%arg0: i32) -> (i32, i32) {
    %c0_i32 = arith.constant 0 : i32
    %c0_i32_0 = arith.constant 0 : i32
    %c0_i32_1 = arith.constant 0 : i32
    return %c0_i32, %c0_i32_0 : i32, i32
  }
  func.func @transform_3(%arg0: i32) -> (i32, i32) {
    %c0_i32 = arith.constant 0 : i32
    %c0_i32_0 = arith.constant 0 : i32
    %c0_i32_1 = arith.constant 0 : i32
    return %c0_i32, %c0_i32_0 : i32, i32
  }
  func.func @transform_4(%arg0: i32) -> (i32, i32) {
    %c0_i32 = arith.constant 0 : i32
    %c0_i32_0 = arith.constant 0 : i32
    %c0_i32_1 = arith.constant 0 : i32
    return %c0_i32, %c0_i32_0 : i32, i32
  }
  func.func @transform_5(%arg0: i32) -> (i32, i32) {
    %c0_i32 = arith.constant 0 : i32
    %c0_i32_0 = arith.constant 0 : i32
    %c0_i32_1 = arith.constant 0 : i32
    return %c0_i32, %c0_i32_0 : i32, i32
  }
  func.func @transform_6(%arg0: i32) -> (i32, i32) {
    %c0_i32 = arith.constant 0 : i32
    %c0_i32_0 = arith.constant 0 : i32
    %c0_i32_1 = arith.constant 0 : i32
    return %c0_i32, %c0_i32_0 : i32, i32
  }
  func.func @transform_7(%arg0: i32) -> (i32, i32) {
    %c0_i32 = arith.constant 0 : i32
    %c0_i32_0 = arith.constant 0 : i32
    %c0_i32_1 = arith.constant 0 : i32
    return %c0_i32, %c0_i32_0 : i32, i32
  }
  func.func @transform_8(%arg0: i32) -> (i32, i32) {
    %c0_i32 = arith.constant 0 : i32
    %c0_i32_0 = arith.constant 0 : i32
    %c0_i32_1 = arith.constant 0 : i32
    return %c0_i32, %c0_i32_0 : i32, i32
  }
  func.func @transform_9(%arg0: i32) -> (i32, i32) {
    %c0_i32 = arith.constant 0 : i32
    %c0_i32_0 = arith.constant 0 : i32
    return %arg0, %c0_i32 : i32, i32
  }
}

</mosaic_0001>

<bundles_post_ra>
// kernel: tpu_custom_call.1
= control target key start
LH: loop header
LB: loop body
LE: loop exit
PB: predicated region body
PF: predicated region fallthrough
CT: control target
= control target key end

     0   :  { %14 = vsyncpa [#allocation3], 0  ;;  %s483_s0 = inlined_call_operand.hbm [shape: f32[8,32], index: 0, kind: input, shape index: {}]   ;;  %s484_s1 = inlined_call_operand.vmem [shape: bf16[32,64], index: 1, kind: input, shape index: {}]   ;;  %s485_s2 = inlined_call_operand.vmem [shape: f32[1,64], index: 2, kind: input, shape index: {}]   ;;  %s486_s3 = inlined_call_operand.vmem [shape: bf16[64,64], index: 3, kind: input, shape index: {}]   ;;  %s487_s4 = inlined_call_operand.vmem [shape: f32[1,64], index: 4, kind: input, shape index: {}]   ;;  %s488_s5 = inlined_call_operand.vmem [shape: bf16[64,32], index: 5, kind: input, shape index: {}]   ;;  %s489_s6 = inlined_call_operand.vmem [shape: f32[1,32], index: 6, kind: input, shape index: {}]   ;;  %s490_s7 = inlined_call_operand.vmem [shape: bf16[32,8], index: 7, kind: input, shape index: {}]   ;;  %s491_s8 = inlined_call_operand.vmem [shape: f32[1,8], index: 8, kind: input, shape index: {}]   ;;  %s492_s9 = inlined_call_operand.hbm [shape: f32[8,8], index: 9, kind: output, shape index: {}]  }
   0x1   :  { %15 = vsyncpa [#allocation4], 0  ;;  %s21_s11 = sshll.u32 %s483_s0, 4  ;;  %s375_s12 = smov [#allocation2]   ;;  %s22_s11 = int_to_ptr.hbm [resolvable:$true] %s21_s11 }
   0x2   :  { %s23_s13 = sshll.u32 %s375_s12, 4  ;;  %s24_s13 = int_to_ptr.vmem [resolvable:$true] %s23_s13 }
   0x3   :  { %26 = dma.hbm_to_vmem [thread:$0]  %s22_s11, 128, %s24_s13, [#allocation3]  }
   0x4   :  { %371 = dma.done.wait [#allocation3], 128  }
   0x5   :  { %372 = vsyncadd [#allocation3], 4294967168  ;;  %v306_v0 = vld [vmem:[%s484_s1 + $0x8] sm:$0xff]  ;;  %v305_v1 = vld [vmem:[%s484_s1] sm:$0xff]  ;;  %vm70_vm0 = vcmask 261120   ;;  %vm125_vm1 = vcmask 523264  }
   0x6   :  { %v310_v2 = vld [vmem:[%s486_s3 + $0x18] sm:$0xff]  ;;  %80 = vmatpush.bf16.msra.mxu0 %v306_v0  ;;  %v48_v3 = vld [vmem:[#allocation2] sm:$0xff]  ;;  %v309_v4 = vld [vmem:[%s486_s3 + $0x10] sm:$0xff]  ;;  %s376_s19 = smov [#allocation5]   ;;  %s243_s21 = sshll.u32 %s492_s9, 4  ;;  %vm234_vm2 = vcmask 64512   ;;  %s244_s21 = int_to_ptr.hbm [resolvable:$true] %s243_s21 }
   0x7   :  { %133 = vmatpush.bf16.msra.mxu1 %v310_v2  ;;  %v49_v5 = vpack.c.bf16 %v48_v3, %v48_v3  ;;  %v308_v6 = vld [vmem:[%s486_s3 + $0x8] sm:$0xff]  ;;  %v307_v7 = vld [vmem:[%s486_s3] sm:$0xff]  ;;  %v314_v8 = vld [vmem:[%s488_s5 + $0x18] sm:$0xff]  ;;  %s241_s0 = sshll.u32 %s376_s19, 4  ;;  %s242_s0 = int_to_ptr.vmem [resolvable:$true] %s241_s0 }
   0x8   :  { %187 = vmatpush.bf16.msra.mxu2 %v314_v8  ;;  %v313_v9 = vld [vmem:[%s488_s5 + $0x10] sm:$0xff]  ;;  %v319_v10 = vld [vmem:[%s485_s2] ss:$0 sm:$0xff]  ;;  %v312_v16 = vld [vmem:[%s488_s5 + $0x8] sm:$0xff] }
   0x9   :  { %v311_v17 = vld [vmem:[%s488_s5] sm:$0xff]  ;;  %v316_v24 = vld [vmem:[%s490_s7 + $0x8] sm:$0xff] }
   0xa   :  { %81 = vmatpush.bf16.msra.mxu0 %v305_v1  ;;  %v320_v18 = vld [vmem:[%s487_s4] ss:$0 sm:$0xff]  ;;  %227 = vmatpush.bf16.msra.mxu3 %v316_v24 }
   0xb   :  { %134 = vmatpush.bf16.msra.mxu1 %v309_v4  ;;  %v315_v25 = vld [vmem:[%s490_s7] sm:$0xff] }
   0xc   :  { %188 = vmatpush.bf16.msra.mxu2 %v313_v9  ;;  %v321_v26 = vld [vmem:[%s489_s6] ss:$0 sm:$0xff] }
   0xd   :  { %261 = vmatmul.msk.bf16.vlgmr.msra.gmra.mxu0 %vm70_vm0, %v49_v5  ;;  %v322_v32 = vld [vmem:[%s491_s8] ss:$0 sm:$0xff] }
   0xe   :  { %228 = vmatpush.bf16.msra.mxu3 %v315_v25 }
   0xf   :  { %135 = vmatpush.bf16.msra.mxu1 %v308_v6 }
  0x10   :  { %189 = vmatpush.bf16.msra.mxu2 %v312_v16 }
  0x13   :  { %136 = vmatpush.bf16.msra.mxu1 %v307_v7 }
  0x14   :  { %190 = vmatpush.bf16.msra.mxu2 %v311_v17 }
  0x8a   :  { %v83_v11 = vpop.f32.mrf.mxu0 }
  0x8b   :  { %v84_v12 = vadd.f32 %v319_v10, %v83_v11 }
  0x8d   :  { %v87_v13 = vmax.f32 %v84_v12, 0.0 }
  0x8f   :  { %v88_v14 = vpack.c.bf16 %v87_v13, %v87_v13 }
  0x91   :  { %278 = vmatmul.msk.bf16.vlgmr.msra.gmra.mxu1 %vm125_vm1, %v88_v14 }
  0x92   :  { %v85_v15 = vpop.f32.mrf.mxu0 }
 0x10e   :  { %v138_v19 = vpop.f32.mrf.mxu1 }
 0x10f   :  { %v139_v20 = vadd.f32 %v320_v18, %v138_v19 }
 0x111   :  { %v142_v21 = vmax.f32 %v139_v20, 0.0 }
 0x113   :  { %v143_v22 = vpack.c.bf16 %v142_v21, %v142_v21 }
 0x115   :  { %295 = vmatmul.msk.bf16.vlgmr.msra.gmra.mxu2 %vm125_vm1, %v143_v22 }
 0x116   :  { %v140_v23 = vpop.f32.mrf.mxu1 }
 0x198   :  { %v192_v27 = vpop.f32.mrf.mxu2 }
 0x199   :  { %v193_v28 = vadd.f32 %v321_v26, %v192_v27 }
 0x19b   :  { %v196_v29 = vmax.f32 %v193_v28, 0.0 }
 0x19d   :  { %v197_v30 = vpack.c.bf16 %v196_v29, %v196_v29 }
 0x19f   :  { %304 = vmatmul.msk.bf16.vlgmr.msra.gmra.mxu3 %vm70_vm0, %v197_v30 }
 0x1a0   :  { %v194_v31 = vpop.f32.mrf.mxu2 }
 0x222   :  { %v230_v33 = vpop.f32.mrf.mxu3 }
 0x223   :  { %v231_v34 = vadd.f32 %v322_v32, %v230_v33 }
 0x225   :  { %235 = vst.msk [vmem:[#allocation5] sm:$0xff] %vm234_vm2, %v231_v34 }
 0x226   :  { %246 = dma.vmem_to_hbm [thread:$0]  %s242_s0, 128, %s244_s21, [#allocation4]  }
 0x22a   :  { %v232_v35 = vpop.f32.mrf.mxu3 }
 0x22b   :  { %373 = dma.done.wait [#allocation4], 128  }
 0x22c   :  { %374 = vsyncadd [#allocation4], 4294967168 }
 0x22d   :  { %251 = vsyncpa [#allocation3], 1 }
 0x22e   :  { %252 = vsyncpa [#allocation4], 1 }

</bundles_post_ra>
